<compile_context>
chip_gen: v6e
topology: v6e:2x2x1
jax: 0.10.0
libtpu: 0.0.40
codegen_flags: <defaults>
</compile_context>

<pallas_src>
import functools

import jax
import jax.numpy as jnp
import numpy as np
from jax.experimental import pallas as pl
from jax.experimental.pallas import tpu as pltpu


# ----------------------------- Pallas kernel ------------------------------

def fused_classifier_kernel(x_ref, wce, bce, w1, b1, w2, b2, w3, b3, w4, b4,
                            o_ref):
    """Fused conv(as matmul)+BN+ReLU followed by the 4-layer MLP.

    x_ref: (TILE_M, 27)   flattened NCHW input rows (zero-padded batch)
    wce:   (27, 144)      effective conv weight (BN folded, padding baked in)
    bce:   (1, 144)       effective conv bias (BN folded)
    w1..w4, b1..b4        FC weights stored as (in, out); w4/b4 zero-padded
                          from 9 to 16 output columns
    o_ref: (TILE_M, 16)   padded logits (first 9 columns are real)
    """
    f32 = jnp.float32
    h = jnp.dot(x_ref[...], wce[...], preferred_element_type=f32) + bce[...]
    h = jnp.maximum(h, 0.0)                                   # conv+BN+ReLU
    h = jnp.dot(h, w1[...], preferred_element_type=f32) + b1[...]
    h = jnp.maximum(h, 0.0)
    h = jnp.dot(h, w2[...], preferred_element_type=f32) + b2[...]
    h = jnp.maximum(h, 0.0)
    h = jnp.dot(h, w3[...], preferred_element_type=f32) + b3[...]
    h = jnp.maximum(h, 0.0)
    o_ref[...] = jnp.dot(h, w4[...], preferred_element_type=f32) + b4[...]


# ------------------------- parameter preparation ---------------------------

def _conv_selection_tensor():
    """S[out_pos, in_pos, kh, kw] = 1 where a 3x3/pad-1 conv tap hits."""
    S = np.zeros((9, 9, 3, 3), np.float32)
    for oh in range(3):
        for ow in range(3):
            for kh in range(3):
                for kw in range(3):
                    ih, iw = oh + kh - 1, ow + kw - 1
                    if 0 <= ih < 3 and 0 <= iw < 3:
                        S[oh * 3 + ow, ih * 3 + iw, kh, kw] = 1.0
    return jnp.asarray(S)


def fold_params(params, eps=1e-5):
    """Fold BN into the conv, lower the conv to a (27,144) matmul, and pad
    the last FC layer to 16 lanes.  Call once; results feed the kernel."""
    scale = params["gamma"] / jnp.sqrt(params["rvar"] + eps)      # (16,)
    shift = params["beta"] - params["rmean"] * scale              # (16,)

    wc_scaled = params["wc"] * scale[:, None, None, None]         # (16,3,3,3)
    b_eff = params["bc"] * scale + shift                          # (16,)

    S = _conv_selection_tensor()                                  # (9,9,3,3)
    # W_eff[c*9+q, o*9+p] = sum_{kh,kw} S[p,q,kh,kw] * wc_scaled[o,c,kh,kw]
    w_eff = jnp.einsum("pqhw,ochw->cqop", S, wc_scaled).reshape(27, 144)
    b_eff_full = jnp.repeat(b_eff, 9).reshape(1, 144)             # col = o*9+p

    return {
        "wce": w_eff,
        "bce": b_eff_full,
        "w1": params["w1"], "b1": params["b1"].reshape(1, 64),
        "w2": params["w2"], "b2": params["b2"].reshape(1, 32),
        "w3": params["w3"], "b3": params["b3"].reshape(1, 16),
        # pad final layer 9 -> 16 output columns for lane-dense stores
        "w4": jnp.pad(params["w4"], ((0, 0), (0, 7))),
        "b4": jnp.pad(params["b4"], (0, 7)).reshape(1, 16),
    }


# ------------------------------ JAX wrapper --------------------------------

def _round_up(v, m):
    return (v + m - 1) // m * m


@functools.partial(jax.jit, static_argnames=())
def classifier_forward(x, folded):
    """Forward pass of Classifier. x: (N, 3, 3, 3) float32 -> (N, 9)."""
    N = x.shape[0]

    # One contiguous (N, 27) load; feature order c*9 + (h*3+w) by construction.
    x_flat = x.reshape(N, 27)

    # Sublane-align / tile the batch dimension.
    tile_m = 512 if N >= 512 else _round_up(N, 8)
    padded_n = _round_up(N, tile_m)
    if padded_n != N:
        x_flat = jnp.pad(x_flat, ((0, padded_n - N), (0, 0)))

    weights = (folded["wce"], folded["bce"],
               folded["w1"], folded["b1"],
               folded["w2"], folded["b2"],
               folded["w3"], folded["b3"],
               folded["w4"], folded["b4"])

    const_map = lambda i: (0, 0)
    in_specs = [pl.BlockSpec((tile_m, 27), lambda i: (i, 0))]
    in_specs += [pl.BlockSpec(w.shape, const_map) for w in weights]

    out = pl.pallas_call(
        fused_classifier_kernel,
        out_shape=jax.ShapeDtypeStruct((padded_n, 16), jnp.float32),
        grid=(padded_n // tile_m,),
        in_specs=in_specs,
        out_specs=pl.BlockSpec((tile_m, 16), lambda i: (i, 0)),
        compiler_params=pltpu.CompilerParams(
            dimension_semantics=("parallel",)),
    )(x_flat, *weights)

    return out[:N, :9]


# ----------------------- deterministic parameter init -----------------------

def init_params(key):
    ks = jax.random.split(key, 16)
    f32 = jnp.float32
    return {
        # Conv2d(3, 16, 3, 1, 1)
        "wc": jax.random.normal(ks[0], (16, 3, 3, 3), f32) * 0.1,
        "bc": jax.random.normal(ks[1], (16,), f32) * 0.1,
        # BatchNorm2d(16) (eval mode: running stats)
        "gamma": 1.0 + jax.random.normal(ks[2], (16,), f32) * 0.1,
        "beta": jax.random.normal(ks[3], (16,), f32) * 0.1,
        "rmean": jax.random.normal(ks[4], (16,), f32) * 0.1,
        "rvar": 1.0 + jnp.abs(jax.random.normal(ks[5], (16,), f32)) * 0.1,
        # Linear layers (stored as (in, out) so the kernel does x @ W)
        "w1": jax.random.normal(ks[6], (144, 64), f32) * 0.1,
        "b1": jax.random.normal(ks[7], (64,), f32) * 0.1,
        "w2": jax.random.normal(ks[8], (64, 32), f32) * 0.1,
        "b2": jax.random.normal(ks[9], (32,), f32) * 0.1,
        "w3": jax.random.normal(ks[10], (32, 16), f32) * 0.1,
        "b3": jax.random.normal(ks[11], (16,), f32) * 0.1,
        "w4": jax.random.normal(ks[12], (16, 9), f32) * 0.1,
        "b4": jax.random.normal(ks[13], (9,), f32) * 0.1,
    }


# ------------------------- pure-JAX reference check -------------------------

def classifier_reference(x, params):
    eps = 1e-5
    y = jax.lax.conv_general_dilated(
        x, params["wc"], window_strides=(1, 1), padding=((1, 1), (1, 1)),
        dimension_numbers=("NCHW", "OIHW", "NCHW"))
    y = y + params["bc"][None, :, None, None]
    scale = params["gamma"] / jnp.sqrt(params["rvar"] + eps)
    shift = params["beta"] - params["rmean"] * scale
    y = y * scale[None, :, None, None] + shift[None, :, None, None]
    y = jnp.maximum(y, 0.0)
    h = y.reshape(y.shape[0], -1)
    h = jnp.maximum(h @ params["w1"] + params["b1"], 0.0)
    h = jnp.maximum(h @ params["w2"] + params["b2"], 0.0)
    h = jnp.maximum(h @ params["w3"] + params["b3"], 0.0)
    return h @ params["w4"] + params["b4"]


if __name__ == "__main__":
    key = jax.random.PRNGKey(0)
    k_x, k_p = jax.random.split(key)

    # Tictactoe board: batch=2, 3 input channels, 3x3 spatial (NCHW).
    x = jax.random.normal(k_x, (2, 3, 3, 3), jnp.float32)
    params = init_params(k_p)

    folded = jax.tree_util.tree_map(jax.block_until_ready, fold_params(params))

    out = classifier_forward(x, folded)
    out = jax.block_until_ready(out)

    ref = jax.block_until_ready(classifier_reference(x, params))
    np.testing.assert_allclose(np.asarray(out), np.asarray(ref),
                               rtol=1e-4, atol=1e-4)

    assert out.shape == (2, 9)
    print("KERNEL_OK")
</pallas_src>

<mosaic_0001>
module attributes {stable_mosaic.version = 11 : i64} {
  func.func @fused_classifier_kernel(%arg0: i32, %arg1: memref<8x27xf32, #tpu.memory_space<vmem>>, %arg2: memref<27x144xf32, #tpu.memory_space<vmem>>, %arg3: memref<1x144xf32, #tpu.memory_space<vmem>>, %arg4: memref<144x64xf32, #tpu.memory_space<vmem>>, %arg5: memref<1x64xf32, #tpu.memory_space<vmem>>, %arg6: memref<64x32xf32, #tpu.memory_space<vmem>>, %arg7: memref<1x32xf32, #tpu.memory_space<vmem>>, %arg8: memref<32x16xf32, #tpu.memory_space<vmem>>, %arg9: memref<1x16xf32, #tpu.memory_space<vmem>>, %arg10: memref<16x16xf32, #tpu.memory_space<vmem>>, %arg11: memref<1x16xf32, #tpu.memory_space<vmem>>, %arg12: memref<8x16xf32, #tpu.memory_space<vmem>>) attributes {dimension_semantics = [#tpu.dimension_semantics<parallel>], iteration_bounds = array<i64: 1>, scalar_prefetch = 0 : i64, scratch_operands = 0 : i64, tpu.core_type = #tpu.core_type<tc>, window_params = [{transform_indices = @transform_0, window_bounds = array<i64: 8, 27>}, {pipeline_mode = #tpu.pipeline_mode<synchronous>, transform_indices = @transform_1, window_bounds = array<i64: 27, 144>}, {pipeline_mode = #tpu.pipeline_mode<synchronous>, transform_indices = @transform_2, window_bounds = array<i64: 1, 144>}, {pipeline_mode = #tpu.pipeline_mode<synchronous>, transform_indices = @transform_3, window_bounds = array<i64: 144, 64>}, {pipeline_mode = #tpu.pipeline_mode<synchronous>, transform_indices = @transform_4, window_bounds = array<i64: 1, 64>}, {pipeline_mode = #tpu.pipeline_mode<synchronous>, transform_indices = @transform_5, window_bounds = array<i64: 64, 32>}, {pipeline_mode = #tpu.pipeline_mode<synchronous>, transform_indices = @transform_6, window_bounds = array<i64: 1, 32>}, {pipeline_mode = #tpu.pipeline_mode<synchronous>, transform_indices = @transform_7, window_bounds = array<i64: 32, 16>}, {pipeline_mode = #tpu.pipeline_mode<synchronous>, transform_indices = @transform_8, window_bounds = array<i64: 1, 16>}, {pipeline_mode = #tpu.pipeline_mode<synchronous>, transform_indices = @transform_9, window_bounds = array<i64: 16, 16>}, {pipeline_mode = #tpu.pipeline_mode<synchronous>, transform_indices = @transform_10, window_bounds = array<i64: 1, 16>}, {transform_indices = @transform_11, window_bounds = array<i64: 8, 16>}]} {
    %c0 = arith.constant 0 : index
    %c0_0 = arith.constant 0 : index
    %0 = vector.load %arg1[%c0, %c0_0] : memref<8x27xf32, #tpu.memory_space<vmem>>, vector<8x27xf32>
    %c0_1 = arith.constant 0 : index
    %c0_2 = arith.constant 0 : index
    %1 = vector.load %arg2[%c0_1, %c0_2] : memref<27x144xf32, #tpu.memory_space<vmem>>, vector<27x144xf32>
    %cst = arith.constant dense<0.000000e+00> : vector<8x144xf32>
    %2 = tpu.matmul %0, %1, %cst {dimension_numbers = #tpu.dot_dimension_numbers<[1], [0], [0], [1], [0, 0, 1, 1], [], []>} : vector<8x27xf32>, vector<27x144xf32>, vector<8x144xf32> -> vector<8x144xf32>
    %c0_3 = arith.constant 0 : index
    %c0_4 = arith.constant 0 : index
    %3 = vector.load %arg3[%c0_3, %c0_4] : memref<1x144xf32, #tpu.memory_space<vmem>>, vector<1x144xf32>
    %4 = vector.broadcast %3 : vector<1x144xf32> to vector<8x144xf32>
    %5 = arith.addf %2, %4 : vector<8x144xf32>
    %cst_5 = arith.constant 0.000000e+00 : f32
    %6 = vector.broadcast %cst_5 : f32 to vector<8x144xf32>
    %7 = arith.maximumf %5, %6 : vector<8x144xf32>
    %c0_6 = arith.constant 0 : index
    %c0_7 = arith.constant 0 : index
    %8 = vector.load %arg4[%c0_6, %c0_7] : memref<144x64xf32, #tpu.memory_space<vmem>>, vector<144x64xf32>
    %cst_8 = arith.constant dense<0.000000e+00> : vector<8x64xf32>
    %9 = tpu.matmul %7, %8, %cst_8 {dimension_numbers = #tpu.dot_dimension_numbers<[1], [0], [0], [1], [0, 0, 1, 1], [], []>} : vector<8x144xf32>, vector<144x64xf32>, vector<8x64xf32> -> vector<8x64xf32>
    %c0_9 = arith.constant 0 : index
    %c0_10 = arith.constant 0 : index
    %10 = vector.load %arg5[%c0_9, %c0_10] : memref<1x64xf32, #tpu.memory_space<vmem>>, vector<1x64xf32>
    %11 = vector.broadcast %10 : vector<1x64xf32> to vector<8x64xf32>
    %12 = arith.addf %9, %11 : vector<8x64xf32>
    %cst_11 = arith.constant 0.000000e+00 : f32
    %13 = vector.broadcast %cst_11 : f32 to vector<8x64xf32>
    %14 = arith.maximumf %12, %13 : vector<8x64xf32>
    %c0_12 = arith.constant 0 : index
    %c0_13 = arith.constant 0 : index
    %15 = vector.load %arg6[%c0_12, %c0_13] : memref<64x32xf32, #tpu.memory_space<vmem>>, vector<64x32xf32>
    %cst_14 = arith.constant dense<0.000000e+00> : vector<8x32xf32>
    %16 = tpu.matmul %14, %15, %cst_14 {dimension_numbers = #tpu.dot_dimension_numbers<[1], [0], [0], [1], [0, 0, 1, 1], [], []>} : vector<8x64xf32>, vector<64x32xf32>, vector<8x32xf32> -> vector<8x32xf32>
    %c0_15 = arith.constant 0 : index
    %c0_16 = arith.constant 0 : index
    %17 = vector.load %arg7[%c0_15, %c0_16] : memref<1x32xf32, #tpu.memory_space<vmem>>, vector<1x32xf32>
    %18 = vector.broadcast %17 : vector<1x32xf32> to vector<8x32xf32>
    %19 = arith.addf %16, %18 : vector<8x32xf32>
    %cst_17 = arith.constant 0.000000e+00 : f32
    %20 = vector.broadcast %cst_17 : f32 to vector<8x32xf32>
    %21 = arith.maximumf %19, %20 : vector<8x32xf32>
    %c0_18 = arith.constant 0 : index
    %c0_19 = arith.constant 0 : index
    %22 = vector.load %arg8[%c0_18, %c0_19] : memref<32x16xf32, #tpu.memory_space<vmem>>, vector<32x16xf32>
    %cst_20 = arith.constant dense<0.000000e+00> : vector<8x16xf32>
    %23 = tpu.matmul %21, %22, %cst_20 {dimension_numbers = #tpu.dot_dimension_numbers<[1], [0], [0], [1], [0, 0, 1, 1], [], []>} : vector<8x32xf32>, vector<32x16xf32>, vector<8x16xf32> -> vector<8x16xf32>
    %c0_21 = arith.constant 0 : index
    %c0_22 = arith.constant 0 : index
    %24 = vector.load %arg9[%c0_21, %c0_22] : memref<1x16xf32, #tpu.memory_space<vmem>>, vector<1x16xf32>
    %25 = vector.broadcast %24 : vector<1x16xf32> to vector<8x16xf32>
    %26 = arith.addf %23, %25 : vector<8x16xf32>
    %cst_23 = arith.constant 0.000000e+00 : f32
    %27 = vector.broadcast %cst_23 : f32 to vector<8x16xf32>
    %28 = arith.maximumf %26, %27 : vector<8x16xf32>
    %c0_24 = arith.constant 0 : index
    %c0_25 = arith.constant 0 : index
    %29 = vector.load %arg10[%c0_24, %c0_25] : memref<16x16xf32, #tpu.memory_space<vmem>>, vector<16x16xf32>
    %cst_26 = arith.constant dense<0.000000e+00> : vector<8x16xf32>
    %30 = tpu.matmul %28, %29, %cst_26 {dimension_numbers = #tpu.dot_dimension_numbers<[1], [0], [0], [1], [0, 0, 1, 1], [], []>} : vector<8x16xf32>, vector<16x16xf32>, vector<8x16xf32> -> vector<8x16xf32>
    %c0_27 = arith.constant 0 : index
    %c0_28 = arith.constant 0 : index
    %31 = vector.load %arg11[%c0_27, %c0_28] : memref<1x16xf32, #tpu.memory_space<vmem>>, vector<1x16xf32>
    %32 = vector.broadcast %31 : vector<1x16xf32> to vector<8x16xf32>
    %33 = arith.addf %30, %32 : vector<8x16xf32>
    %c0_29 = arith.constant 0 : index
    %c0_30 = arith.constant 0 : index
    %34 = vector.load %arg12[%c0_29, %c0_30] : memref<8x16xf32, #tpu.memory_space<vmem>>, vector<8x16xf32>
    tpu.vector_store %arg12[%c0_29, %c0_30], %33 {strides = array<i32>} : memref<8x16xf32, #tpu.memory_space<vmem>>, vector<8x16xf32>,
    return
  }
  func.func @transform_0(%arg0: i32) -> (i32, i32) {
    %c0_i32 = arith.constant 0 : i32
    %c0_i32_0 = arith.constant 0 : i32
    return %arg0, %c0_i32 : i32, i32
  }
  func.func @transform_1(%arg0: i32) -> (i32, i32) {
    %c0_i32 = arith.constant 0 : i32
    %c0_i32_0 = arith.constant 0 : i32
    %c0_i32_1 = arith.constant 0 : i32
    return %c0_i32, %c0_i32_0 : i32, i32
  }
  func.func @transform_2(%arg0: i32) -> (i32, i32) {
    %c0_i32 = arith.constant 0 : i32
    %c0_i32_0 = arith.constant 0 : i32
    %c0_i32_1 = arith.constant 0 : i32
    return %c0_i32, %c0_i32_0 : i32, i32
  }
  func.func @transform_3(%arg0: i32) -> (i32, i32) {
    %c0_i32 = arith.constant 0 : i32
    %c0_i32_0 = arith.constant 0 : i32
    %c0_i32_1 = arith.constant 0 : i32
    return %c0_i32, %c0_i32_0 : i32, i32
  }
  func.func @transform_4(%arg0: i32) -> (i32, i32) {
    %c0_i32 = arith.constant 0 : i32
    %c0_i32_0 = arith.constant 0 : i32
    %c0_i32_1 = arith.constant 0 : i32
    return %c0_i32, %c0_i32_0 : i32, i32
  }
  func.func @transform_5(%arg0: i32) -> (i32, i32) {
    %c0_i32 = arith.constant 0 : i32
    %c0_i32_0 = arith.constant 0 : i32
    %c0_i32_1 = arith.constant 0 : i32
    return %c0_i32, %c0_i32_0 : i32, i32
  }
  func.func @transform_6(%arg0: i32) -> (i32, i32) {
    %c0_i32 = arith.constant 0 : i32
    %c0_i32_0 = arith.constant 0 : i32
    %c0_i32_1 = arith.constant 0 : i32
    return %c0_i32, %c0_i32_0 : i32, i32
  }
  func.func @transform_7(%arg0: i32) -> (i32, i32) {
    %c0_i32 = arith.constant 0 : i32
    %c0_i32_0 = arith.constant 0 : i32
    %c0_i32_1 = arith.constant 0 : i32
    return %c0_i32, %c0_i32_0 : i32, i32
  }
  func.func @transform_8(%arg0: i32) -> (i32, i32) {
    %c0_i32 = arith.constant 0 : i32
    %c0_i32_0 = arith.constant 0 : i32
    %c0_i32_1 = arith.constant 0 : i32
    return %c0_i32, %c0_i32_0 : i32, i32
  }
  func.func @transform_9(%arg0: i32) -> (i32, i32) {
    %c0_i32 = arith.constant 0 : i32
    %c0_i32_0 = arith.constant 0 : i32
    %c0_i32_1 = arith.constant 0 : i32
    return %c0_i32, %c0_i32_0 : i32, i32
  }
  func.func @transform_10(%arg0: i32) -> (i32, i32) {
    %c0_i32 = arith.constant 0 : i32
    %c0_i32_0 = arith.constant 0 : i32
    %c0_i32_1 = arith.constant 0 : i32
    return %c0_i32, %c0_i32_0 : i32, i32
  }
  func.func @transform_11(%arg0: i32) -> (i32, i32) {
    %c0_i32 = arith.constant 0 : i32
    %c0_i32_0 = arith.constant 0 : i32
    return %arg0, %c0_i32 : i32, i32
  }
}

</mosaic_0001>

<bundles_post_ra>
// kernel: classifier_forward.1
= control target key start
LH: loop header
LB: loop body
LE: loop exit
PB: predicated region body
PF: predicated region fallthrough
CT: control target
= control target key end

     0   :  { %vm63_vm0 = vcmask 1042432   ;;  %v573_v3 = vmov 0.0   ;;  %vm59_vm1 = vcmask 220160   ;;  %v49_v33 = vlaneseq  ;;  %s818_s1 = inlined_call_operand.vmem [shape: f32[27,144], index: 1, kind: input, shape index: {}]   ;;  %s819_s3 = inlined_call_operand.vmem [shape: f32[144,64], index: 3, kind: input, shape index: {}]   ;;  %s820_s0 = inlined_call_operand.vmem [shape: f32[8,27], index: 0, kind: input, shape index: {}]   ;;  %s821_s5 = inlined_call_operand.vmem [shape: f32[64,32], index: 5, kind: input, shape index: {}]   ;;  %s822_s2 = inlined_call_operand.vmem [shape: f32[1,144], index: 2, kind: input, shape index: {}]   ;;  %s823_s4 = inlined_call_operand.vmem [shape: f32[1,64], index: 4, kind: input, shape index: {}]   ;;  %s824_s7 = inlined_call_operand.vmem [shape: f32[32,16], index: 7, kind: input, shape index: {}]   ;;  %s825_s6 = inlined_call_operand.vmem [shape: f32[1,32], index: 6, kind: input, shape index: {}]   ;;  %s826_s9 = inlined_call_operand.vmem [shape: f32[16,16], index: 9, kind: input, shape index: {}]   ;;  %s827_s8 = inlined_call_operand.vmem [shape: f32[1,16], index: 8, kind: input, shape index: {}]   ;;  %s828_s10 = inlined_call_operand.vmem [shape: f32[1,16], index: 10, kind: input, shape index: {}]   ;;  %s829_s11 = inlined_call_operand.vmem [shape: f32[8,16], index: 11, kind: output, shape index: {}]  }
   0x1   :  { %v46_v0 = vld [vmem:[%s818_s1 + $0x38] sm:$0x7]  ;;  %v45_v1 = vld [vmem:[%s818_s1 + $0x30] sm:$0x7]  ;;  %v44_v2 = vld [vmem:[%s818_s1 + $0x28] sm:$0xff]  ;;  %134 = vmatprep.mubr.f32.mxu0 %v573_v3  ;;  %172 = vmatprep.subr.mxu1 %v573_v3  ;;  %vm168_vm2 = vcmask 130048  }
   0x2   :  { %506 = vmatprep.subr.msk.mxu0 %vm63_vm0, %v46_v0  ;;  %v43_v4 = vld [vmem:[%s818_s1 + $0x20] sm:$0xff]  ;;  %v42_v5 = vld [vmem:[%s818_s1 + $0x18] sm:$0xff]  ;;  %v41_v6 = vld [vmem:[%s818_s1 + $0x10] sm:$0xff]  ;;  %v50_v34 = vshrl.u32 %v49_v33, 7  ;;  %vm574_vm3 = vmmov 0   ;;  %vm258_vm4 = vcmask 523264  }
   0x3   :  { %507 = vmatpush1.msk.msra.mxu0 %vm63_vm0, %v45_v1  ;;  %v158_v7 = vld [vmem:[%s819_s3 + $0x78] sm:$0xff]  ;;  %v157_v8 = vld [vmem:[%s819_s3 + $0x70] sm:$0xff]  ;;  %v40_v9 = vld [vmem:[%s818_s1 + $0x8] sm:$0xff]  ;;  %vm344_vm5 = vcmask 261120  }
   0x4   :  { %96 = vmatprep.subr.mxu0 %v44_v2  ;;  %173 = vmatpush1.msra.mxu1 %v158_v7  ;;  %v39_v10 = vld [vmem:[%s818_s1] sm:$0xff]  ;;  %v156_v11 = vld [vmem:[%s819_s3 + $0x68] sm:$0xff]  ;;  %v154_v14 = vld [vmem:[%s819_s3 + $0x58] sm:$0xff]  ;;  %v51_v35 = vsub.s32 0, %v50_v34  ;;  %v55_v37 = vsub.s32 1, %v50_v34 }
   0x5   :  { %97 = vmatpush1.msra.mxu0 %v43_v4  ;;  %174 = vmatprep.subr.mxu1 %v573_v3  ;;  %v38_v12 = vld [vmem:[%s820_s0] sm:$0xff]  ;;  %v153_v15 = vld [vmem:[%s819_s3 + $0x50] sm:$0xff]  ;;  %v152_v16 = vld [vmem:[%s819_s3 + $0x48] sm:$0xff] }
   0x6   :  { %98 = vmatprep.subr.mxu0 %v42_v5  ;;  %175 = vmatpush1.msra.mxu1 %v157_v8  ;;  %v155_v13 = vld [vmem:[%s819_s3 + $0x60] sm:$0xff]  ;;  %v150_v18 = vld [vmem:[%s819_s3 + $0x38] sm:$0xff]  ;;  %v149_v19 = vld [vmem:[%s819_s3 + $0x30] sm:$0xff] }
   0x7   :  { %99 = vmatpush1.msra.mxu0 %v41_v6  ;;  %176 = vmatprep.subr.mxu1 %v573_v3  ;;  %v151_v17 = vld [vmem:[%s819_s3 + $0x40] sm:$0xff]  ;;  %v148_v20 = vld [vmem:[%s819_s3 + $0x28] sm:$0xff]  ;;  %v146_v22 = vld [vmem:[%s819_s3 + $0x18] sm:$0xff] }
   0x8   :  { %100 = vmatprep.subr.mxu0 %v40_v9  ;;  %177 = vmatpush1.msra.mxu1 %v156_v11  ;;  %v147_v21 = vld [vmem:[%s819_s3 + $0x20] sm:$0xff]  ;;  %v145_v23 = vld [vmem:[%s819_s3 + $0x10] sm:$0xff]  ;;  %v144_v24 = vld [vmem:[%s819_s3 + $0x8] sm:$0xff] }
   0x9   :  { %101 = vmatpush1.msra.mxu0 %v39_v10  ;;  %178 = vmatprep.subr.mxu1 %v573_v3  ;;  %v143_v25 = vld [vmem:[%s819_s3] sm:$0xff]  ;;  %v160_v26 = vld [vmem:[%s819_s3 + $0x88] sm:$0xff]  ;;  %v250_v28 = vld [vmem:[%s821_s5 + $0x38] sm:$0xff] }
   0xa   :  { %508 = vmatmul.mubr.msk.f32.vlgmr.msra.gmra.mxu0 %vm59_vm1, %v38_v12  ;;  %179 = vmatpush1.msra.mxu1 %v155_v13  ;;  %v159_v27 = vld [vmem:[%s819_s3 + $0x80] sm:$0xff]  ;;  %v249_v29 = vld [vmem:[%s821_s5 + $0x30] sm:$0xff]  ;;  %v248_v30 = vld [vmem:[%s821_s5 + $0x28] sm:$0xff] }
   0xb   :  { %534 = vmatprep.subr.mxu0 %v573_v3  ;;  %180 = vmatprep.subr.mxu1 %v573_v3  ;;  %v247_v31 = vld [vmem:[%s821_s5 + $0x20] sm:$0xff]  ;;  %v246_v32 = vld [vmem:[%s821_s5 + $0x18] sm:$0xff]  ;;  %v245_v46 = vld [vmem:[%s821_s5 + $0x10] sm:$0xff] }
   0xc   :  { %181 = vmatpush1.msra.mxu1 %v154_v14  ;;  %535 = vmatpush3.msra.mxu0 %v250_v28  ;;  %v47_v36 = vld [vmem:[%s822_s2] sm:$0x3]  ;;  %v244_v47 = vld [vmem:[%s821_s5 + $0x8] sm:$0xff]  ;;  %v336_v54 = vld [vmem:[%s824_s7 + $0x18] sm:$0xff] }
   0xd   :  { %182 = vmatprep.subr.mxu1 %v573_v3  ;;  %536 = vmatprep.subr.mxu0 %v573_v3  ;;  %v52_v38 = vrot.slane %v47_v36, %v51_v35  ;;  %v56_v39 = vrot.slane %v47_v36, %v55_v37  ;;  %v243_v48 = vld [vmem:[%s821_s5] sm:$0xff]  ;;  %v335_v55 = vld [vmem:[%s824_s7 + $0x10] sm:$0xff]  ;;  %v334_v56 = vld [vmem:[%s824_s7 + $0x8] sm:$0xff] }
   0xe   :  { %183 = vmatpush1.msra.mxu1 %v153_v15  ;;  %537 = vmatpush3.msra.mxu0 %v249_v29  ;;  %v509_v49 = vld [vmem:[%s823_s4] ss:$0 sm:$0xff]  ;;  %v420_v63 = vld [vmem:[%s826_s9 + $0x8] sm:$0xff] }
   0xf   :  { %184 = vmatprep.subr.mxu1 %v573_v3  ;;  %538 = vmatprep.subr.mxu0 %v573_v3  ;;  %v333_v57 = vld [vmem:[%s824_s7] sm:$0xff] }
  0x10   :  { %185 = vmatpush1.msra.mxu1 %v152_v16  ;;  %539 = vmatpush3.msra.mxu0 %v248_v30  ;;  %v511_v58 = vld [vmem:[%s825_s6] ss:$0 sm:$0xff] }
  0x11   :  { %186 = vmatprep.subr.mxu1 %v573_v3  ;;  %540 = vmatprep.subr.mxu0 %v573_v3  ;;  %v419_v0 = vld [vmem:[%s826_s9] sm:$0xff] }
  0x12   :  { %187 = vmatpush1.msra.mxu1 %v151_v17  ;;  %541 = vmatpush3.msra.mxu0 %v247_v31  ;;  %v513_v1 = vld [vmem:[%s827_s8] ss:$0 sm:$0xff] }
  0x13   :  { %188 = vmatprep.subr.mxu1 %v573_v3  ;;  %542 = vmatprep.subr.mxu0 %v573_v3  ;;  %v515_v7 = vld [vmem:[%s828_s10] ss:$0 sm:$0xff] }
  0x14   :  { %189 = vmatpush1.msra.mxu1 %v150_v18  ;;  %543 = vmatpush3.msra.mxu0 %v246_v32 }
  0x15   :  { %190 = vmatprep.subr.mxu1 %v573_v3  ;;  %544 = vmatprep.subr.mxu0 %v573_v3 }
  0x16   :  { %191 = vmatpush1.msra.mxu1 %v149_v19  ;;  %545 = vmatpush3.msra.mxu0 %v245_v46 }
  0x17   :  { %192 = vmatprep.subr.mxu1 %v573_v3  ;;  %546 = vmatprep.subr.mxu0 %v573_v3 }
  0x18   :  { %193 = vmatpush1.msra.mxu1 %v148_v20  ;;  %547 = vmatpush3.msra.mxu0 %v244_v47 }
  0x19   :  { %194 = vmatprep.subr.mxu1 %v573_v3  ;;  %548 = vmatprep.subr.mxu0 %v573_v3 }
  0x1a   :  { %195 = vmatpush1.msra.mxu1 %v147_v21  ;;  %549 = vmatpush3.msra.mxu0 %v243_v48 }
  0x1b   :  { %196 = vmatprep.subr.mxu1 %v573_v3  ;;  %550 = vmatprep.mubr.msk.f32.mxu0 %vm574_vm3, %v573_v3 }
  0x1c   :  { %197 = vmatpush1.msra.mxu1 %v146_v22  ;;  %553 = vmatprep.subr.mxu0 %v573_v3 }
  0x1d   :  { %198 = vmatprep.subr.mxu1 %v573_v3 }
  0x1e   :  { %199 = vmatpush1.msra.mxu1 %v145_v23 }
  0x1f   :  { %200 = vmatprep.subr.mxu1 %v573_v3 }
  0x20   :  { %201 = vmatpush1.msra.mxu1 %v144_v24 }
  0x21   :  { %202 = vmatprep.subr.mxu1 %v573_v3 }
  0x22   :  { %203 = vmatpush1.msra.mxu1 %v143_v25 }
  0x23   :  { %232 = vmatprep.subr.mxu1 %v573_v3 }
  0x24   :  { %233 = vmatpush2.msra.mxu1 %v160_v26 }
  0x25   :  { %234 = vmatprep.subr.mxu1 %v573_v3 }
  0x26   :  { %235 = vmatpush2.msra.mxu1 %v159_v27 }
  0xca   :  { %v136_v40 = vpop.f32.mrf.mxu0 }
  0xcb   :  { %v137_v41 = vadd.f32 %v136_v40, %v52_v38 }
  0xcc   :  { %v138_v42 = vpop.f32.mrf.mxu0 }
  0xcd   :  { %v139_v43 = vadd.f32 %v138_v42, %v56_v39  ;;  %v141_v45 = vmax.f32 %v137_v41, 0.0 }
  0xcf   :  { %v142_v44 = vmax.f32 %v139_v43, 0.0 }
  0xd1   :  { %510 = vmatprep.mubr.msk.f32.mxu1 %vm168_vm2, %v142_v44 }
  0xd2   :  { %237 = vmatmul.mubr.f32.vlgmr.msra.gmra.mxu1 %v141_v45 }
 0x192   :  { %v238_v50 = vpop.f32.mrf.mxu1 }
 0x193   :  { %v239_v51 = vadd.f32 %v509_v49, %v238_v50 }
 0x194   :  { %v240_v52 = vpop.f32.mrf.mxu1 }
 0x195   :  { %v242_v53 = vmax.f32 %v239_v51, 0.0 }
 0x197   :  { %551 = vmatmul.mubr.msk.f32.vlgmr.msra.gmra.mxu0 %vm258_vm4, %v242_v53 }
 0x198   :  { %554 = vmatpush3.msra.mxu0 %v336_v54  ;;  %561 = vmatprep.mubr.msk.f32.mxu0 %vm574_vm3, %v573_v3 }
 0x199   :  { %555 = vmatprep.subr.mxu0 %v573_v3 }
 0x19a   :  { %556 = vmatpush3.msra.mxu0 %v335_v55 }
 0x19b   :  { %557 = vmatprep.subr.mxu0 %v573_v3 }
 0x19c   :  { %558 = vmatpush3.msra.mxu0 %v334_v56 }
 0x19d   :  { %559 = vmatprep.subr.mxu0 %v573_v3 }
 0x19e   :  { %560 = vmatpush3.msra.mxu0 %v333_v57 }
 0x19f   :  { %564 = vmatprep.subr.mxu0 %v573_v3 }
 0x257   :  { %v328_v59 = vpop.f32.mrf.mxu0 }
 0x258   :  { %v329_v60 = vadd.f32 %v511_v58, %v328_v59 }
 0x259   :  { %v552_v61 = vpop.f32.mrf.mxu0 }
 0x25a   :  { %v332_v62 = vmax.f32 %v329_v60, 0.0 }
 0x25c   :  { %562 = vmatmul.mubr.msk.f32.vlgmr.msra.gmra.mxu0 %vm344_vm5, %v332_v62 }
 0x25d   :  { %568 = vmatprep.mubr.msk.f32.mxu0 %vm574_vm3, %v573_v3  ;;  %565 = vmatpush3.msra.mxu0 %v420_v63 }
 0x25e   :  { %566 = vmatprep.subr.mxu0 %v573_v3 }
 0x25f   :  { %567 = vmatpush3.msra.mxu0 %v419_v0 }
 0x31c   :  { %v414_v2 = vpop.f32.mrf.mxu0 }
 0x31d   :  { %v415_v4 = vadd.f32 %v513_v1, %v414_v2 }
 0x31e   :  { %v563_v5 = vpop.f32.mrf.mxu0 }
 0x31f   :  { %v418_v6 = vmax.f32 %v415_v4, 0.0 }
 0x321   :  { %569 = vmatmul.mubr.msk.f32.vlgmr.msra.gmra.mxu0 %vm168_vm2, %v418_v6 }
 0x3e1   :  { %v497_v3 = vpop.f32.mrf.mxu0 }
 0x3e2   :  { %v498_v8 = vadd.f32 %v515_v7, %v497_v3 }
 0x3e3   :  { %v570_v9 = vpop.f32.mrf.mxu0 }
 0x3e4   :  { %501 = vst.msk [vmem:[%s829_s11] sm:$0xff] %vm168_vm2, %v498_v8 }

</bundles_post_ra>
